<compile_context>
chip_gen: v5e
topology: v5e:2x2
jax: 0.10.0
libtpu: 0.0.40
codegen_flags: <defaults>
</compile_context>

<pallas_src>
import functools

import jax
import jax.numpy as jnp
from jax import lax
from jax.experimental import pallas as pl
from jax.experimental.pallas import tpu as pltpu

ALPHA = 0.05
LANES = 128
SUBLANES = 8
MAX_BLOCK_ROWS = 4096          # (4096, 128) f32 block = 2 MiB per input
NUM_CHUNKS = 2                 # leading "parallel" axis (2 TCs on v7x)


def _bce_blur_kernel(pred_ref, true_ref, o_ref, *, n_total, alpha,
                     block_rows, steps, num_blocks):
    c = pl.program_id(0)               # chunk (parallel across TensorCores)
    k = pl.program_id(1)               # reduction step within the chunk
    blk = c * steps + k                # unclamped global row-block index

    @pl.when(k == 0)
    def _init():
        o_ref[...] = jnp.zeros_like(o_ref)

    x = pred_ref[...].astype(jnp.float32)
    y = true_ref[...].astype(jnp.float32)

    # Numerically stable BCE-with-logits (matches torch.nn.BCEWithLogitsLoss).
    e = jnp.exp(-jnp.abs(x))                       # reused below for sigmoid
    loss = jnp.maximum(x, 0.0) - x * y + jnp.log1p(e)

    # sigmoid(x) = 1/(1+e) for x >= 0, and e/(1+e) = 1 - 1/(1+e) for x < 0.
    d = 1.0 + e
    r = pl.reciprocal(d, approx=True)
    r = r * (2.0 - d * r)                          # Newton step -> f32 accuracy
    p = jnp.where(x >= 0.0, r, 1.0 - r)

    dx = p - y
    loss = loss * (1.0 - jnp.exp((dx - 1.0) / (alpha + 1e-4)))

    def _partial_sum(vals):
        # (block_rows, 128) -> (block_rows//8, 8, 128); summing the leading
        # axis is layout-preserving vreg adds on the VPU (no XLU work).
        return vals.reshape(-1, SUBLANES, LANES).sum(axis=0)

    # Only the globally-last valid block (ragged / padded tail) and the at
    # most one clamped duplicate block on the final chunk can contain invalid
    # elements, so the mask cost is paid on at most one step per chunk.
    is_tail = blk >= num_blocks - 1

    @pl.when(jnp.logical_not(is_tail))
    def _accumulate():
        o_ref[...] += _partial_sum(loss)

    @pl.when(is_tail)
    def _accumulate_masked():
        # NOTE: int32 indexing assumes n_total < 2**31 elements.
        block_elems = block_rows * LANES
        remaining = jnp.int32(n_total) - blk * jnp.int32(block_elems)
        row_idx = lax.broadcasted_iota(jnp.int32, (block_rows, LANES), 0)
        col_idx = lax.broadcasted_iota(jnp.int32, (block_rows, LANES), 1)
        local = row_idx * LANES + col_idx
        o_ref[...] += _partial_sum(jnp.where(local < remaining, loss, 0.0))


def bce_blur_with_logits_loss(pred, true, alpha=ALPHA):
    """Pallas TPU implementation of BCEBlurWithLogitsLoss.forward."""
    assert pred.shape == true.shape
    n_total = pred.size
    assert n_total > 0

    # Flatten; inputs stay in their original dtype (kernel casts to f32).
    pred_flat = pred.reshape(-1)
    true_flat = true.reshape(-1)

    # Minimal pad so the flat length is a multiple of 8*128 (one f32 tile);
    # no-op (no extra HBM pass) whenever numel is already a multiple of 1024.
    tile_elems = SUBLANES * LANES
    n_pad = (-n_total) % tile_elems
    if n_pad:
        pred_flat = jnp.pad(pred_flat, (0, n_pad))
        true_flat = jnp.pad(true_flat, (0, n_pad))
    rows = (n_total + n_pad) // LANES              # multiple of 8

    pred2d = pred_flat.reshape(rows, LANES)
    true2d = true_flat.reshape(rows, LANES)

    block_rows = min(MAX_BLOCK_ROWS, rows)         # multiple of 8
    num_blocks = (rows + block_rows - 1) // block_rows
    num_chunks = min(NUM_CHUNKS, num_blocks)
    steps = (num_blocks + num_chunks - 1) // num_chunks

    def in_index_map(c, k):
        # Clamp so every grid point maps to an in-bounds block; the at most
        # one duplicated block on the final chunk is fully masked in-kernel.
        return (jnp.minimum(c * steps + k, num_blocks - 1), 0)

    kernel = functools.partial(_bce_blur_kernel, n_total=n_total, alpha=alpha,
                               block_rows=block_rows, steps=steps,
                               num_blocks=num_blocks)

    partials = pl.pallas_call(
        kernel,
        out_shape=jax.ShapeDtypeStruct((num_chunks * SUBLANES, LANES),
                                       jnp.float32),
        grid_spec=pltpu.PrefetchScalarGridSpec(
            num_scalar_prefetch=0,
            grid=(num_chunks, steps),
            in_specs=[
                pl.BlockSpec((block_rows, LANES), in_index_map),
                pl.BlockSpec((block_rows, LANES), in_index_map),
            ],
            out_specs=pl.BlockSpec((SUBLANES, LANES), lambda c, k: (c, 0)),
        ),
        compiler_params=pltpu.CompilerParams(
            dimension_semantics=("parallel", "arbitrary"),
        ),
    )(pred2d, true2d)

    # Single tiny cross-lane/sublane reduction (num_chunks*8, 128) -> scalar.
    return jnp.sum(partials) / jnp.float32(n_total)


def _reference(pred, true, alpha=ALPHA):
    x = pred.astype(jnp.float32)
    y = true.astype(jnp.float32)
    loss = jnp.maximum(x, 0.0) - x * y + jnp.log1p(jnp.exp(-jnp.abs(x)))
    p = jax.nn.sigmoid(x)
    dx = p - y
    loss = loss * (1.0 - jnp.exp((dx - 1.0) / (alpha + 1e-4)))
    return jnp.mean(loss)


if __name__ == "__main__":
    key = jax.random.PRNGKey(0)
    k1, k2, k3, k4 = jax.random.split(key, 4)

    # Small detection-head-ish shape: single-block path.
    pred = jax.random.normal(k1, (2, 4, 16, 16), dtype=jnp.float32)
    true = (jax.random.uniform(k2, (2, 4, 16, 16)) > 0.5).astype(jnp.float32)
    out = jax.block_until_ready(bce_blur_with_logits_loss(pred, true))
    ref = _reference(pred, true)
    assert jnp.allclose(out, ref, atol=1e-5, rtol=1e-5), (out, ref)

    # Larger shape: exercises multi-block, 2-chunk (megacore) and ragged-tail
    # masking paths (rows = 9600 -> 3 blocks of 4096 rows across 2 chunks).
    pred2 = jax.random.normal(k3, (16, 3, 160, 160), dtype=jnp.float32)
    true2 = (jax.random.uniform(k4, (16, 3, 160, 160)) > 0.5).astype(jnp.float32)
    out2 = jax.block_until_ready(bce_blur_with_logits_loss(pred2, true2))
    ref2 = _reference(pred2, true2)
    assert jnp.allclose(out2, ref2, atol=1e-5, rtol=1e-5), (out2, ref2)

    print("KERNEL_OK")
</pallas_src>

<mosaic_0001>
module attributes {stable_mosaic.version = 11 : i64} {
  func.func @_bce_blur_kernel(%arg0: i32, %arg1: i32, %arg2: memref<16x128xf32, #tpu.memory_space<vmem>>, %arg3: memref<16x128xf32, #tpu.memory_space<vmem>>, %arg4: memref<8x128xf32, #tpu.memory_space<vmem>>) attributes {dimension_semantics = [#tpu.dimension_semantics<parallel>, #tpu.dimension_semantics<arbitrary>], iteration_bounds = array<i64: 1, 1>, scalar_prefetch = 0 : i64, scratch_operands = 0 : i64, tpu.core_type = #tpu.core_type<tc>, window_params = [{transform_indices = @transform_0, window_bounds = array<i64: 16, 128>}, {transform_indices = @transform_1, window_bounds = array<i64: 16, 128>}, {transform_indices = @transform_2, window_bounds = array<i64: 8, 128>}]} {
    %c1_i32 = arith.constant 1 : i32
    %0 = arith.muli %arg0, %c1_i32 : i32
    %1 = arith.addi %0, %arg1 : i32
    %c0_i32 = arith.constant 0 : i32
    %2 = arith.cmpi eq, %arg1, %c0_i32 : i32
    %3 = arith.extui %2 : i1 to i32
    %c0_i32_0 = arith.constant 0 : i32
    %4 = arith.cmpi ne, %3, %c0_i32_0 : i32
    scf.if %4 {
      %cst_15 = arith.constant 0.000000e+00 : f32
      %44 = vector.broadcast %cst_15 : f32 to vector<8x128xf32>
      %c0_16 = arith.constant 0 : index
      %c0_17 = arith.constant 0 : index
      %45 = vector.load %arg4[%c0_16, %c0_17] : memref<8x128xf32, #tpu.memory_space<vmem>>, vector<8x128xf32>
      tpu.vector_store %arg4[%c0_16, %c0_17], %44 {strides = array<i32>} : memref<8x128xf32, #tpu.memory_space<vmem>>, vector<8x128xf32>,
    } else {
    }
    %c0 = arith.constant 0 : index
    %c0_1 = arith.constant 0 : index
    %5 = vector.load %arg2[%c0, %c0_1] : memref<16x128xf32, #tpu.memory_space<vmem>>, vector<16x128xf32>
    %c0_2 = arith.constant 0 : index
    %c0_3 = arith.constant 0 : index
    %6 = vector.load %arg3[%c0_2, %c0_3] : memref<16x128xf32, #tpu.memory_space<vmem>>, vector<16x128xf32>
    %7 = math.absf %5 : vector<16x128xf32>
    %cst = arith.constant 0.000000e+00 : f32
    %8 = vector.broadcast %cst : f32 to vector<16x128xf32>
    %9 = arith.subf %8, %7 : vector<16x128xf32>
    %10 = math.exp %9 : vector<16x128xf32>
    %cst_4 = arith.constant 0.000000e+00 : f32
    %11 = vector.broadcast %cst_4 : f32 to vector<16x128xf32>
    %12 = arith.maximumf %5, %11 : vector<16x128xf32>
    %13 = arith.mulf %5, %6 : vector<16x128xf32>
    %14 = arith.subf %12, %13 : vector<16x128xf32>
    %15 = math.log1p %10 : vector<16x128xf32>
    %16 = arith.addf %14, %15 : vector<16x128xf32>
    %cst_5 = arith.constant 1.000000e+00 : f32
    %17 = vector.broadcast %cst_5 : f32 to vector<16x128xf32>
    %18 = arith.addf %17, %10 : vector<16x128xf32>
    %19 = tpu.reciprocal %18 {approx = true} : vector<16x128xf32> -> vector<16x128xf32>
    %20 = arith.mulf %18, %19 : vector<16x128xf32>
    %cst_6 = arith.constant 2.000000e+00 : f32
    %21 = vector.broadcast %cst_6 : f32 to vector<16x128xf32>
    %22 = arith.subf %21, %20 : vector<16x128xf32>
    %23 = arith.mulf %19, %22 : vector<16x128xf32>
    %cst_7 = arith.constant 0.000000e+00 : f32
    %24 = vector.broadcast %cst_7 : f32 to vector<16x128xf32>
    %25 = arith.cmpf oge, %5, %24 : vector<16x128xf32>
    %cst_8 = arith.constant 1.000000e+00 : f32
    %26 = vector.broadcast %cst_8 : f32 to vector<16x128xf32>
    %27 = arith.subf %26, %23 : vector<16x128xf32>
    %28 = arith.select %25, %23, %27 : vector<16x128xi1>, vector<16x128xf32>
    %29 = arith.subf %28, %6 : vector<16x128xf32>
    %cst_9 = arith.constant 1.000000e+00 : f32
    %30 = vector.broadcast %cst_9 : f32 to vector<16x128xf32>
    %31 = arith.subf %29, %30 : vector<16x128xf32>
    %cst_10 = arith.constant 5.010000e-02 : f32
    %32 = vector.broadcast %cst_10 : f32 to vector<16x128xf32>
    %33 = arith.divf %31, %32 : vector<16x128xf32>
    %34 = math.exp %33 : vector<16x128xf32>
    %cst_11 = arith.constant 1.000000e+00 : f32
    %35 = vector.broadcast %cst_11 : f32 to vector<16x128xf32>
    %36 = arith.subf %35, %34 : vector<16x128xf32>
    %37 = arith.mulf %16, %36 : vector<16x128xf32>
    %c0_i32_12 = arith.constant 0 : i32
    %38 = arith.cmpi sge, %1, %c0_i32_12 : i32
    %true = arith.constant true
    %39 = arith.xori %38, %true : i1
    %40 = arith.extui %39 : i1 to i32
    %c0_i32_13 = arith.constant 0 : i32
    %41 = arith.cmpi ne, %40, %c0_i32_13 : i32
    scf.if %41 {
      %c0_15 = arith.constant 0 : index
      %c0_16 = arith.constant 0 : index
      %44 = vector.load %arg4[%c0_15, %c0_16] : memref<8x128xf32, #tpu.memory_space<vmem>>, vector<8x128xf32>
      %45 = vector.shape_cast %37 : vector<16x128xf32> to vector<2x8x128xf32>
      %cst_17 = arith.constant dense<0.000000e+00> : vector<8x128xf32>
      %46 = vector.multi_reduction <add>, %45, %cst_17 [0] : vector<2x8x128xf32> to vector<8x128xf32>
      %47 = arith.addf %44, %46 : vector<8x128xf32>
      %c0_18 = arith.constant 0 : index
      %c0_19 = arith.constant 0 : index
      %48 = vector.load %arg4[%c0_18, %c0_19] : memref<8x128xf32, #tpu.memory_space<vmem>>, vector<8x128xf32>
      tpu.vector_store %arg4[%c0_18, %c0_19], %47 {strides = array<i32>} : memref<8x128xf32, #tpu.memory_space<vmem>>, vector<8x128xf32>,
    } else {
    }
    %42 = arith.extui %38 : i1 to i32
    %c0_i32_14 = arith.constant 0 : i32
    %43 = arith.cmpi ne, %42, %c0_i32_14 : i32
    scf.if %43 {
      %c2048_i32 = arith.constant 2048 : i32
      %44 = arith.muli %1, %c2048_i32 : i32
      %c2048_i32_15 = arith.constant 2048 : i32
      %45 = arith.subi %c2048_i32_15, %44 : i32
      %46 = tpu.iota {dimensions = array<i32: 0>} : vector<16x128xi32>
      %47 = tpu.iota {dimensions = array<i32: 1>} : vector<16x128xi32>
      %c128_i32 = arith.constant 128 : i32
      %48 = vector.broadcast %c128_i32 : i32 to vector<16x128xi32>
      %49 = arith.muli %46, %48 : vector<16x128xi32>
      %50 = arith.addi %49, %47 : vector<16x128xi32>
      %c0_16 = arith.constant 0 : index
      %c0_17 = arith.constant 0 : index
      %51 = vector.load %arg4[%c0_16, %c0_17] : memref<8x128xf32, #tpu.memory_space<vmem>>, vector<8x128xf32>
      %52 = vector.broadcast %45 : i32 to vector<16x128xi32>
      %53 = arith.cmpi slt, %50, %52 : vector<16x128xi32>
      %cst_18 = arith.constant 0.000000e+00 : f32
      %54 = vector.broadcast %cst_18 : f32 to vector<16x128xf32>
      %55 = arith.select %53, %37, %54 : vector<16x128xi1>, vector<16x128xf32>
      %56 = vector.shape_cast %55 : vector<16x128xf32> to vector<2x8x128xf32>
      %cst_19 = arith.constant dense<0.000000e+00> : vector<8x128xf32>
      %57 = vector.multi_reduction <add>, %56, %cst_19 [0] : vector<2x8x128xf32> to vector<8x128xf32>
      %58 = arith.addf %51, %57 : vector<8x128xf32>
      %c0_20 = arith.constant 0 : index
      %c0_21 = arith.constant 0 : index
      %59 = vector.load %arg4[%c0_20, %c0_21] : memref<8x128xf32, #tpu.memory_space<vmem>>, vector<8x128xf32>
      tpu.vector_store %arg4[%c0_20, %c0_21], %58 {strides = array<i32>} : memref<8x128xf32, #tpu.memory_space<vmem>>, vector<8x128xf32>,
    } else {
    }
    return
  }
  func.func @transform_0(%arg0: i32, %arg1: i32) -> (i32, i32) {
    %c1_i32 = arith.constant 1 : i32
    %0 = arith.muli %arg0, %c1_i32 : i32
    %1 = arith.addi %0, %arg1 : i32
    %c0_i32 = arith.constant 0 : i32
    %2 = arith.minsi %1, %c0_i32 : i32
    %c0_i32_0 = arith.constant 0 : i32
    %c0_i32_1 = arith.constant 0 : i32
    return %2, %c0_i32_0 : i32, i32
  }
  func.func @transform_1(%arg0: i32, %arg1: i32) -> (i32, i32) {
    %c1_i32 = arith.constant 1 : i32
    %0 = arith.muli %arg0, %c1_i32 : i32
    %1 = arith.addi %0, %arg1 : i32
    %c0_i32 = arith.constant 0 : i32
    %2 = arith.minsi %1, %c0_i32 : i32
    %c0_i32_0 = arith.constant 0 : i32
    %c0_i32_1 = arith.constant 0 : i32
    return %2, %c0_i32_0 : i32, i32
  }
  func.func @transform_2(%arg0: i32, %arg1: i32) -> (i32, i32) {
    %c0_i32 = arith.constant 0 : i32
    %c0_i32_0 = arith.constant 0 : i32
    return %arg0, %c0_i32 : i32, i32
  }
}

</mosaic_0001>

<bundles_post_ra>
// kernel: tpu_custom_call.1
= control target key start
LH: loop header
LB: loop body
LE: loop exit
PB: predicated region body
PF: predicated region fallthrough
CT: control target
= control target key end

     0   :  { %7 = vsyncpa [#allocation3], 0  ;;  %s346_s0 = inlined_call_operand.hbm [shape: f32[16,128], index: 0, kind: input, shape index: {}]   ;;  %s347_s1 = inlined_call_operand.hbm [shape: f32[16,128], index: 1, kind: input, shape index: {}]   ;;  %s348_s2 = inlined_call_operand.hbm [shape: f32[8,128], index: 2, kind: output, shape index: {}]  }
   0x1   :  { %8 = vsyncpa [#allocation6], 0 }
   0x2   :  { %9 = vsyncpa [#allocation4], 0  ;;  %s20_s11 = sshll.u32 %s346_s0, 4  ;;  %s304_s12 = smov [#allocation2]   ;;  %s21_s11 = int_to_ptr.hbm [resolvable:$true] %s20_s11 }
   0x3   :  { %s22_s13 = sshll.u32 %s304_s12, 4  ;;  %s39_s16 = sshll.u32 %s347_s1, 4  ;;  %s23_s13 = int_to_ptr.vmem [resolvable:$true] %s22_s13  ;;  %s40_s16 = int_to_ptr.hbm [resolvable:$true] %s39_s16 }
   0x4   :  { %s305_s17 = smov 128   ;;  %s306_s18 = smov 8  }
   0x5   :  { %28 = dma.hbm_to_vmem [thread:$0]  %s21_s11, 256, %s23_s13, [#allocation3], %s305_s17, %s305_s17, %s306_s18  }
   0x6   :  { %s307_s19 = smov [#allocation5]  }
   0x7   :  { %s41_s20 = sshll.u32 %s307_s19, 4  ;;  %s42_s20 = int_to_ptr.vmem [resolvable:$true] %s41_s20 }
   0x8   :  { %47 = dma.hbm_to_vmem [thread:$0]  %s40_s16, 256, %s42_s20, [#allocation6], %s305_s17, %s305_s17, %s306_s18  }
   0x9   :  { %298 = dma.done.wait [#allocation3], 256  }
   0xa   :  { %299 = vsyncadd [#allocation3], 4294967040 }
   0xb   :  { %300 = dma.done.wait [#allocation6], 256  }
   0xc   :  { %301 = vsyncadd [#allocation6], 4294967040  ;;  %v331_v0 = vld [vmem:[#allocation2] sm:$0xff]  ;;  %v333_v1 = vld [vmem:[#allocation2 + $0x8] sm:$0xff]  ;;  %v308_v8 = vmov 0.0501   ;;  %v159_v28 = vlaneseq }
   0xd   :  { %v74_v2 = vand.u32 2147483647, %v331_v0  ;;  %v75_v3 = vand.u32 2147483647, %v333_v1  ;;  %vm118_vm0 = vcmp.ge.f32.partialorder %v331_v0, 0.0  ;;  %vm119_vm1 = vcmp.ge.f32.partialorder %v333_v1, 0.0 }
   0xe   :  { %v72_v25 = vld [vmem:[#allocation5] sm:$0xff]  ;;  %v73_v29 = vld [vmem:[#allocation5 + $0x8] sm:$0xff]  ;;  %v160_v38 = vshrl.u32 %v159_v28, 7  ;;  %v82_v46 = vmax.f32 %v331_v0, 0.0  ;;  %v83_v49 = vmax.f32 %v333_v1, 0.0  ;;  %v163_v60 = vand.u32 127, %v159_v28 }
   0xf   :  { %v76_v4 = vsub.f32 0.0, %v74_v2  ;;  %v77_v5 = vsub.f32 0.0, %v75_v3  ;;  %v84_v50 = vmul.f32 %v72_v25, %v331_v0  ;;  %v85_v53 = vmul.f32 %v73_v29, %v333_v1  ;;  %s309_s0 = smov [#allocation7]   ;;  %s184_s23 = sshll.u32 %s348_s2, 4  ;;  %s185_s23 = int_to_ptr.hbm [resolvable:$true] %s184_s23 }
  0x10   :  { %v161_v52 = vadd.s32 8, %v160_v38  ;;  %v164_v61 = vmul.u32 128, %v160_v38  ;;  %s182_s1 = sshll.u32 %s309_s0, 4  ;;  %s183_s1 = int_to_ptr.vmem [resolvable:$true] %s182_s1 }
  0x11   :  { %v78_v6 = vmul.f32 1.442695, %v76_v4  ;;  %v80_v7 = vmul.f32 1.442695, %v77_v5  ;;  %v86_v62 = vsub.f32 %v82_v46, %v84_v50  ;;  %v87_v2 = vsub.f32 %v83_v49, %v85_v53 }
  0x12   :  { %v165_v63 = vmul.u32 128, %v161_v52  ;;  %v166_v4 = vadd.s32 %v164_v61, %v163_v60 }
  0x13   :  { %208 = vpow2.f32 %v78_v6 }
  0x14   :  { %210 = vpow2.f32 %v80_v7  ;;  %v167_v1 = vadd.s32 %v165_v63, %v163_v60  ;;  %vm170_vm5 = vcmp.lt.s32.totalorder %v166_v4, 2048 }
  0x15   :  { %212 = vrcp.f32 %v308_v8 }
  0x16   :  { %vm171_vm6 = vcmp.lt.s32.totalorder %v167_v1, 2048 }
  0x19   :  { %v209_v9 = vpop.eup %208 }
  0x1a   :  { %v211_v10 = vpop.eup %210  ;;  %v88_v11 = vadd.f32 1.0, %v209_v9  ;;  %v91_v30 = vmul.f32 -0.5, %v209_v9  ;;  %v94_v42 = vand.u32 2147483647, %v209_v9 }
  0x1b   :  { %v97_v12 = vadd.f32 1.0, %v211_v10  ;;  %v213_v13 = vpop.eup %212  ;;  %v100_v32 = vmul.f32 -0.5, %v211_v10  ;;  %v103_v47 = vand.u32 2147483647, %v211_v10 }
  0x1c   :  { %214 = vrcp.f32 %v88_v11  ;;  %v129_v14 = vmul.f32 0.0501, %v213_v13  ;;  %vm133_vm2 = vweird.f32 %v213_v13  ;;  %v92_v39 = vadd.f32 1.0, %v91_v30 }
  0x1d   :  { %216 = vrcp.f32 %v97_v12  ;;  %v101_v43 = vadd.f32 1.0, %v100_v32  ;;  %vm95_vm3 = vcmp.lt.f32.partialorder %v94_v42, 0.0004427343  ;;  %vm104_vm4 = vcmp.lt.f32.partialorder %v103_v47, 0.0004427343 }
  0x1e   :  { %v130_v15 = vsub.f32 1.0, %v129_v14  ;;  %218 = vlog2.f32 %v88_v11  ;;  %v93_v55 = vmul.f32 %v209_v9, %v92_v39 }
  0x1f   :  { %220 = vlog2.f32 %v97_v12  ;;  %v102_v58 = vmul.f32 %v211_v10, %v101_v43 }
  0x20   :  { %v131_v21 = vmul.f32 %v213_v13, %v130_v15 }
  0x22   :  { %v215_v16 = vpop.eup %214  ;;  %v132_v27 = vadd.f32 %v213_v13, %v131_v21 }
  0x23   :  { %v217_v17 = vpop.eup %216  ;;  %v112_v18 = vmul.f32 %v215_v16, %v88_v11 }
  0x24   :  { %v113_v19 = vmul.f32 %v217_v17, %v97_v12  ;;  %v134_v37 = vsel %vm133_vm2, %v213_v13, %v132_v27  ;;  %v219_v41 = vpop.eup %218 }
  0x25   :  { %v114_v20 = vsub.f32 2.0, %v112_v18  ;;  %v221_v45 = vpop.eup %220  ;;  %v90_v54 = vmul.f32 0.6931472, %v219_v41 }
  0x26   :  { %v115_v22 = vsub.f32 2.0, %v113_v19  ;;  %v99_v57 = vmul.f32 0.6931472, %v221_v45 }
  0x27   :  { %v116_v23 = vmul.f32 %v215_v16, %v114_v20  ;;  %v96_v0 = vsel %vm95_vm3, %v93_v55, %v90_v54 }
  0x28   :  { %v117_v24 = vmul.f32 %v217_v17, %v115_v22  ;;  %v105_v3 = vsel %vm104_vm4, %v102_v58, %v99_v57  ;;  %v106_v5 = vadd.f32 %v96_v0, %v86_v62 }
  0x29   :  { %v120_v26 = vsub.f32 1.0, %v116_v23  ;;  %v107_v7 = vadd.f32 %v105_v3, %v87_v2 }
  0x2a   :  { %v121_v31 = vsub.f32 1.0, %v117_v24 }
  0x2b   :  { %v122_v33 = vsel %vm118_vm0, %v116_v23, %v120_v26 }
  0x2c   :  { %v123_v34 = vsel %vm119_vm1, %v117_v24, %v121_v31  ;;  %v124_v35 = vsub.f32 %v122_v33, %v72_v25 }
  0x2d   :  { %v125_v36 = vsub.f32 %v123_v34, %v73_v29 }
  0x2e   :  { %v199_v40 = vadd.f32 -1.0, %v124_v35 }
  0x2f   :  { %v200_v44 = vadd.f32 -1.0, %v125_v36 }
  0x30   :  { %v135_v48 = vmul.f32 %v199_v40, %v134_v37 }
  0x31   :  { %v136_v51 = vmul.f32 %v200_v44, %v134_v37 }
  0x32   :  { %v137_v56 = vmul.f32 1.442695, %v135_v48 }
  0x33   :  { %v139_v59 = vmul.f32 1.442695, %v136_v51 }
  0x34   :  { %222 = vpow2.f32 %v137_v56 }
  0x35   :  { %224 = vpow2.f32 %v139_v59 }
  0x3a   :  { %v223_v6 = vpop.eup %222 }
  0x3b   :  { %v225_v8 = vpop.eup %224  ;;  %v141_v9 = vsub.f32 1.0, %v223_v6 }
  0x3c   :  { %v142_v11 = vsub.f32 1.0, %v225_v8 }
  0x3d   :  { %v143_v10 = vmul.f32 %v141_v9, %v106_v5 }
  0x3e   :  { %v144_v12 = vmul.f32 %v142_v11, %v107_v7 }
  0x3f   :  { %v172_v13 = vsel %vm170_vm5, %v143_v10, 0.0 }
  0x40   :  { %v173_v14 = vsel %vm171_vm6, %v144_v12, 0.0 }
  0x41   :  { %v174_v15 = vadd.f32 %v173_v14, %v172_v13 }
  0x43   :  { %176 = vst [vmem:[#allocation7] sm:$0xff] %v174_v15 }
  0x44   :  { %187 = dma.vmem_to_hbm [thread:$0]  %s183_s1, 128, %s185_s23, [#allocation4]  }
  0x45   :  { %302 = dma.done.wait [#allocation4], 128  }
  0x46   :  { %303 = vsyncadd [#allocation4], 4294967168 }
  0x47   :  { %192 = vsyncpa [#allocation3], 1 }
  0x48   :  { %193 = vsyncpa [#allocation6], 1 }
  0x49   :  { %194 = vsyncpa [#allocation4], 1 }

</bundles_post_ra>
